<compile_context>
chip_gen: v6e
topology: v6e:2x2x1
jax: 0.10.0
libtpu: 0.0.40
codegen_flags: <defaults>
</compile_context>

<pallas_src>
import jax
import jax.numpy as jnp
from jax.experimental import pallas as pl
from jax.experimental.pallas import tpu as pltpu


def _patch_embed_kernel(x_ref, w_ref, b_ref, o_ref):
    # (tile_r, 128) @ (128, 256) on the MXU with f32 accumulation; bias add in
    # f32 on the VPU; single cast on the way out.
    acc = jnp.dot(x_ref[...], w_ref[...], preferred_element_type=jnp.float32)
    o_ref[...] = (acc + b_ref[...]).astype(o_ref.dtype)


def prepare_patch_embed_params(weight, bias, *, param_dtype=None):
    """One-time parameter prep (hoisted out of the forward path).

    Conv1d weight (E, C, k) -> (K, E) with K = k*C flattened in (k, c) order so
    it matches the row-major patch flatten of x, then expanded to a
    block-diagonal (pack*K, pack*E) matrix so `pack` patches are projected per
    lane-dense row.  Bias is tiled to one (1, pack*E) f32 row.
    """
    E, C, k = weight.shape
    K = k * C
    # Pack enough patches per row to fill the 128-lane vreg (8 for K=16).
    pack = 128 // K if (K <= 128 and 128 % K == 0) else 1
    w_flat = jnp.transpose(weight, (2, 1, 0)).reshape(K, E)
    eye = jnp.eye(pack, dtype=w_flat.dtype)
    w_bd = jnp.einsum("ij,ke->ikje", eye, w_flat).reshape(pack * K, pack * E)
    if param_dtype is not None:
        w_bd = w_bd.astype(param_dtype)
    # Bias stays f32: the add happens on the f32 accumulator before the final cast.
    b_row = jnp.tile(bias.astype(jnp.float32), pack).reshape(1, pack * E)
    return w_bd, b_row


def patch_embed(x, w_bd, b_row, *, patch_size, tile_rows=2048):
    """x: (B, T, C); w_bd: (pack*patch*C, pack*E); b_row: (1, pack*E) -> (B, T//patch, E)."""
    B, T, C = x.shape
    assert T % patch_size == 0, "T must be divisible by patch_size"
    K = patch_size * C
    Kp, Ep = w_bd.shape
    assert Kp % K == 0, "weight was prepared for a different (patch, C)"
    pack = Kp // K
    E = Ep // pack
    P = T // patch_size
    M = B * P

    # Carve patches: row-major reshape (free) -> (M, K), inner order (k, c),
    # then pack `pack` patches per lane-dense row.  Pad at most pack-1 rows.
    x_patches = x.reshape(M, K)
    m_pad = pl.cdiv(M, pack) * pack
    if m_pad != M:
        x_patches = jnp.pad(x_patches, ((0, m_pad - M), (0, 0)))
    rows = m_pad // pack
    x_packed = x_patches.reshape(rows, Kp)  # byte-identical view

    # Tile the packed-row axis.  Sublane granularity: 8 for 4-byte dtypes, 16
    # for 2-byte (bf16); a single full-extent block is always legal when small.
    sub = 8 if jnp.dtype(x.dtype).itemsize >= 4 else 16
    if rows <= tile_rows:
        tile_r, grid_r = rows, 1
    else:
        tile_r = max(sub, (tile_rows // sub) * sub)
        grid_r = pl.cdiv(rows, tile_r)  # ragged final block handled by Pallas

    cost = pl.CostEstimate(
        flops=2 * rows * Kp * Ep,  # what the MXU actually executes
        transcendentals=0,
        bytes_accessed=(rows * Kp * jnp.dtype(x.dtype).itemsize
                        + Kp * Ep * jnp.dtype(w_bd.dtype).itemsize
                        + Ep * jnp.dtype(b_row.dtype).itemsize
                        + rows * Ep * jnp.dtype(x.dtype).itemsize),
    )

    out = pl.pallas_call(
        _patch_embed_kernel,
        out_shape=jax.ShapeDtypeStruct((rows, Ep), x.dtype),
        grid_spec=pltpu.PrefetchScalarGridSpec(
            num_scalar_prefetch=0,
            grid=(grid_r,),
            in_specs=[
                pl.BlockSpec((tile_r, Kp), lambda i: (i, 0)),  # packed patch rows
                pl.BlockSpec((Kp, Ep), lambda i: (0, 0)),      # block-diag weight (resident)
                pl.BlockSpec((1, Ep), lambda i: (0, 0)),       # packed bias row (resident)
            ],
            out_specs=pl.BlockSpec((tile_r, Ep), lambda i: (i, 0)),
        ),
        compiler_params=pltpu.CompilerParams(
            # Shard rows across v7x's two TensorCores; measured no-op on v5e/v6e.
            dimension_semantics=("parallel",),
            # Headroom above v5e's 16 MiB default scoped VMEM; below physical on all gens.
            vmem_limit_bytes=32 * 1024 * 1024,
        ),
        cost_estimate=cost,
    )(x_packed, w_bd, b_row)

    out_flat = out.reshape(m_pad, E)  # byte-identical row-major view
    if m_pad != M:
        out_flat = out_flat[:M]       # only when M % pack != 0 (<= 7 rows of pad)
    return out_flat.reshape(B, P, E)


def _reference(x, weight, bias, patch_size):
    B, T, C = x.shape
    P = T // patch_size
    xp = x.reshape(B, P, patch_size, C)
    return jnp.einsum("bpkc,eck->bpe", xp, weight) + bias[None, None, :]


if __name__ == "__main__":
    key = jax.random.PRNGKey(0)
    kx, kw, kb, kx2, kx3 = jax.random.split(key, 5)

    # Module config: img_size (=T) = 16, patch_size = 4, in_chans = 4,
    # embed_dim = 32, norm_layer = None.
    B, T, C, patch, E = 2, 16, 4, 4, 32
    x = jax.random.normal(kx, (B, T, C), dtype=jnp.float32)
    weight = jax.random.normal(kw, (E, C, patch), dtype=jnp.float32) * 0.02  # Conv1d (E, C, k)
    bias = jax.random.normal(kb, (E,), dtype=jnp.float32) * 0.01

    w_bd, b_row = prepare_patch_embed_params(weight, bias)  # hoisted, one-time

    # Check 1: module-sized f32 case.
    out = jax.block_until_ready(patch_embed(x, w_bd, b_row, patch_size=patch))
    ref = _reference(x, weight, bias, patch)
    assert out.shape == (B, T // patch, E)
    assert jnp.allclose(out, ref, atol=1e-4, rtol=1e-4)

    # Check 2: multiple grid steps with a ragged final block (rows=10, tile=8).
    B2, T2 = 5, 64
    x2 = jax.random.normal(kx2, (B2, T2, C), dtype=jnp.float32)
    out2 = jax.block_until_ready(
        patch_embed(x2, w_bd, b_row, patch_size=patch, tile_rows=8))
    ref2 = _reference(x2, weight, bias, patch)
    assert out2.shape == (B2, T2 // patch, E)
    assert jnp.allclose(out2, ref2, atol=1e-4, rtol=1e-4)

    # Check 3: B*P not a multiple of the pack factor (pads 3 rows, slices tail).
    B3, T3 = 3, 28
    x3 = jax.random.normal(kx3, (B3, T3, C), dtype=jnp.float32)
    out3 = jax.block_until_ready(patch_embed(x3, w_bd, b_row, patch_size=patch))
    ref3 = _reference(x3, weight, bias, patch)
    assert out3.shape == (B3, T3 // patch, E)
    assert jnp.allclose(out3, ref3, atol=1e-4, rtol=1e-4)

    # Check 4: bf16 I/O path (f32 accumulate + f32 bias add inside the kernel);
    # tolerance loosened per bf16 rounding.  Use only if downstream allows bf16.
    w_bd16, b_row16 = prepare_patch_embed_params(weight, bias, param_dtype=jnp.bfloat16)
    out4 = jax.block_until_ready(
        patch_embed(x.astype(jnp.bfloat16), w_bd16, b_row16, patch_size=patch))
    assert out4.dtype == jnp.bfloat16
    assert jnp.allclose(out4.astype(jnp.float32), ref, atol=2e-2, rtol=2e-2)

    print("KERNEL_OK")
</pallas_src>

<mosaic_0001>
module attributes {stable_mosaic.version = 11 : i64} {
  func.func @_patch_embed_kernel(%arg0: i32, %arg1: memref<1x128xf32, #tpu.memory_space<vmem>>, %arg2: memref<128x256xf32, #tpu.memory_space<vmem>>, %arg3: memref<1x256xf32, #tpu.memory_space<vmem>>, %arg4: memref<1x256xf32, #tpu.memory_space<vmem>>) attributes {dimension_semantics = [#tpu.dimension_semantics<parallel>], iteration_bounds = array<i64: 1>, scalar_prefetch = 0 : i64, scratch_operands = 0 : i64, tpu.core_type = #tpu.core_type<tc>, window_params = [{transform_indices = @transform_0, window_bounds = array<i64: 1, 128>}, {pipeline_mode = #tpu.pipeline_mode<synchronous>, transform_indices = @transform_1, window_bounds = array<i64: 128, 256>}, {pipeline_mode = #tpu.pipeline_mode<synchronous>, transform_indices = @transform_2, window_bounds = array<i64: 1, 256>}, {transform_indices = @transform_3, window_bounds = array<i64: 1, 256>}]} {
    %c0 = arith.constant 0 : index
    %c0_0 = arith.constant 0 : index
    %0 = vector.load %arg1[%c0, %c0_0] : memref<1x128xf32, #tpu.memory_space<vmem>>, vector<1x128xf32>
    %c0_1 = arith.constant 0 : index
    %c0_2 = arith.constant 0 : index
    %1 = vector.load %arg2[%c0_1, %c0_2] : memref<128x256xf32, #tpu.memory_space<vmem>>, vector<128x256xf32>
    %cst = arith.constant dense<0.000000e+00> : vector<1x256xf32>
    %2 = tpu.matmul %0, %1, %cst {dimension_numbers = #tpu.dot_dimension_numbers<[1], [0], [0], [1], [0, 0, 1, 1], [], []>} : vector<1x128xf32>, vector<128x256xf32>, vector<1x256xf32> -> vector<1x256xf32>
    %c0_3 = arith.constant 0 : index
    %c0_4 = arith.constant 0 : index
    %3 = vector.load %arg3[%c0_3, %c0_4] : memref<1x256xf32, #tpu.memory_space<vmem>>, vector<1x256xf32>
    %4 = arith.addf %2, %3 : vector<1x256xf32>
    %c0_5 = arith.constant 0 : index
    %c0_6 = arith.constant 0 : index
    %5 = vector.load %arg4[%c0_5, %c0_6] : memref<1x256xf32, #tpu.memory_space<vmem>>, vector<1x256xf32>
    tpu.vector_store %arg4[%c0_5, %c0_6], %4 {strides = array<i32>} : memref<1x256xf32, #tpu.memory_space<vmem>>, vector<1x256xf32>,
    return
  }
  func.func @transform_0(%arg0: i32) -> (i32, i32) {
    %c0_i32 = arith.constant 0 : i32
    %c0_i32_0 = arith.constant 0 : i32
    return %arg0, %c0_i32 : i32, i32
  }
  func.func @transform_1(%arg0: i32) -> (i32, i32) {
    %c0_i32 = arith.constant 0 : i32
    %c0_i32_0 = arith.constant 0 : i32
    %c0_i32_1 = arith.constant 0 : i32
    return %c0_i32, %c0_i32_0 : i32, i32
  }
  func.func @transform_2(%arg0: i32) -> (i32, i32) {
    %c0_i32 = arith.constant 0 : i32
    %c0_i32_0 = arith.constant 0 : i32
    %c0_i32_1 = arith.constant 0 : i32
    return %c0_i32, %c0_i32_0 : i32, i32
  }
  func.func @transform_3(%arg0: i32) -> (i32, i32) {
    %c0_i32 = arith.constant 0 : i32
    %c0_i32_0 = arith.constant 0 : i32
    return %arg0, %c0_i32 : i32, i32
  }
}

</mosaic_0001>

<bundles_post_ra>
// kernel: tpu_custom_call.1
= control target key start
LH: loop header
LB: loop body
LE: loop exit
PB: predicated region body
PF: predicated region fallthrough
CT: control target
= control target key end

     0   :  { %8 = vsyncpa [#allocation3], 0  ;;  %s308_s0 = inlined_call_operand.hbm [shape: f32[1,128], index: 0, kind: input, shape index: {}]   ;;  %s309_s1 = inlined_call_operand.hbm [shape: f32[128,256], index: 1, kind: input, shape index: {}]   ;;  %s310_s2 = inlined_call_operand.vmem [shape: f32[1,256], index: 2, kind: input, shape index: {}]   ;;  %s311_s3 = inlined_call_operand.hbm [shape: f32[1,256], index: 3, kind: output, shape index: {}]  }
   0x1   :  { %9 = vsyncpa [#allocation6], 0 }
   0x2   :  { %10 = vsyncpa [#allocation4], 0  ;;  %s269_s12 = smov [#allocation2]   ;;  %s270_s14 = smov [#allocation5]  }
   0x3   :  { %s17_s13 = sshll.u32 %s269_s12, 4  ;;  %s26_s15 = sshll.u32 %s270_s14, 4  ;;  %s18_s13 = int_to_ptr.vmem [resolvable:$true] %s17_s13  ;;  %s27_s15 = int_to_ptr.vmem [resolvable:$true] %s26_s15 }
   0x4   :  { %s211_s16 = scalar_lea.vmem %s18_s13, 16  ;;  %s215_s17 = scalar_lea.vmem %s18_s13, 32 }
   0x5   :  { %p212_p0 = scmp.ne.s32.totalorder %s18_s13, %s211_s16  ;;  %p216_p1 = scmp.lt.s32.totalorder %s18_s13, %s18_s13 }
   0x6   :  { %p217_p2 = scmp.lt.s32.totalorder %s215_s17, %s211_s16 }
   0x8   :  { %p218_p3 = por %p217_p2, %p216_p1 }
   0xa   :  { %p219_p4 = pnand %p218_p3, %p212_p0 }
   0xc   :  { %222 = shalt.err (!%p219_p4)
}
   0xd   :  { %20 = dma.hbm_to_vmem [thread:$0]  %s308_s0, 16, %s18_s13, [#allocation3]  }
   0xe   :  { %s231_s20 = scalar_lea.vmem %s27_s15, 4096  ;;  %p236_p6 = scmp.lt.s32.totalorder %s27_s15, %s27_s15 }
   0xf   :  { %p232_p5 = scmp.ne.s32.totalorder %s27_s15, %s231_s20  ;;  %p237_p7 = scmp.lt.s32.totalorder %s231_s20, %s231_s20 }
  0x11   :  { %p238_p8 = por %p237_p7, %p236_p6 }
  0x13   :  { %p239_p9 = pnand %p238_p8, %p232_p5 }
  0x15   :  { %242 = shalt.err (!%p239_p9)
}
  0x16   :  { %s271_s21 = smov 256   ;;  %s272_s22 = smov 16  }
  0x17   :  { %32 = dma.hbm_to_vmem [thread:$0]  %s309_s1, 4096, %s27_s15, [#allocation6], %s271_s21, %s271_s21, %s272_s22  }
  0x18   :  { %263 = dma.done.wait [#allocation3], 16  }
  0x19   :  { %264 = vsyncadd [#allocation3], 4294967280 }
  0x1a   :  { %265 = dma.done.wait [#allocation6], 4096  }
  0x1b   :  { %266 = vsyncadd [#allocation6], 4294963200  ;;  %v273_v0 = vmov 0.0   ;;  %v73_v1 = vld [vmem:[#allocation5 + $0xf8] sm:$0xff]  ;;  %v72_v2 = vld [vmem:[#allocation5 + $0xf0] sm:$0xff]  ;;  %v76_v34 = vlaneseq  ;;  %s275_s25 = smov [#allocation7]  }
  0x1c   :  { %150 = vmatprep.mubr.f32.mxu0 %v273_v0  ;;  %v71_v3 = vld [vmem:[#allocation5 + $0xe8] sm:$0xff]  ;;  %86 = vmatprep.subr.mxu0 %v73_v1  ;;  %v70_v4 = vld [vmem:[#allocation5 + $0xe0] sm:$0xff]  ;;  %v69_v5 = vld [vmem:[#allocation5 + $0xd8] sm:$0xff]  ;;  %v274_v38 = vmov 1966171168   ;;  %s186_s26 = sshll.u32 %s275_s25, 4  ;;  %s187_s26 = int_to_ptr.vmem [resolvable:$true] %s186_s26 }
  0x1d   :  { %87 = vmatpush1.msra.mxu0 %v72_v2  ;;  %v68_v6 = vld [vmem:[#allocation5 + $0xd0] sm:$0xff]  ;;  %v67_v7 = vld [vmem:[#allocation5 + $0xc8] sm:$0xff]  ;;  %v66_v8 = vld [vmem:[#allocation5 + $0xc0] sm:$0xff]  ;;  %v77_v35 = vshrl.u32 %v76_v34, 7  ;;  %v161_v39 = vunpack.c.l.s4 %v274_v38  ;;  %vm177_vm0 = vcmp.lt.s32.totalorder %v76_v34, 256  ;;  %s243_s27 = scalar_lea.vmem %s187_s26, 32  ;;  %p248_p11 = scmp.lt.s32.totalorder %s187_s26, %s187_s26 }
  0x1e   :  { %88 = vmatprep.subr.mxu0 %v71_v3  ;;  %v65_v9 = vld [vmem:[#allocation5 + $0xb8] sm:$0xff]  ;;  %v64_v10 = vld [vmem:[#allocation5 + $0xb0] sm:$0xff]  ;;  %v63_v11 = vld [vmem:[#allocation5 + $0xa8] sm:$0xff]  ;;  %p244_p10 = scmp.ne.s32.totalorder %s187_s26, %s243_s27  ;;  %p249_p12 = scmp.lt.s32.totalorder %s243_s27, %s243_s27 }
  0x1f   :  { %89 = vmatpush1.msra.mxu0 %v70_v4  ;;  %v62_v12 = vld [vmem:[#allocation5 + $0xa0] sm:$0xff]  ;;  %v61_v13 = vld [vmem:[#allocation5 + $0x98] sm:$0xff]  ;;  %v60_v14 = vld [vmem:[#allocation5 + $0x90] sm:$0xff]  ;;  %v78_v36 = vsub.s32 0, %v77_v35  ;;  %v82_v37 = vsub.s32 1, %v77_v35  ;;  %v162_v43 = vunpack.c.0.s8 %v161_v39 }
  0x20   :  { %90 = vmatprep.subr.mxu0 %v69_v5  ;;  %v59_v15 = vld [vmem:[#allocation5 + $0x88] sm:$0xff]  ;;  %v58_v16 = vld [vmem:[#allocation5 + $0x80] sm:$0xff]  ;;  %v57_v17 = vld [vmem:[#allocation5 + $0x78] sm:$0xff]  ;;  %p250_p13 = por %p249_p12, %p248_p11 }
  0x21   :  { %91 = vmatpush1.msra.mxu0 %v68_v6  ;;  %v56_v18 = vld [vmem:[#allocation5 + $0x70] sm:$0xff]  ;;  %v55_v19 = vld [vmem:[#allocation5 + $0x68] sm:$0xff]  ;;  %v54_v20 = vld [vmem:[#allocation5 + $0x60] sm:$0xff]  ;;  %v165_v48 = vsub.s32 %v162_v43, %v77_v35 }
  0x22   :  { %92 = vmatprep.subr.mxu0 %v67_v7  ;;  %v53_v21 = vld [vmem:[#allocation5 + $0x58] sm:$0xff]  ;;  %v52_v22 = vld [vmem:[#allocation5 + $0x50] sm:$0xff]  ;;  %v51_v23 = vld [vmem:[#allocation5 + $0x48] sm:$0xff]  ;;  %p251_p0 = pnand %p250_p13, %p244_p10 }
  0x23   :  { %93 = vmatpush1.msra.mxu0 %v66_v8  ;;  %v50_v24 = vld [vmem:[#allocation5 + $0x40] sm:$0xff]  ;;  %v49_v25 = vld [vmem:[#allocation5 + $0x38] sm:$0xff]  ;;  %v48_v26 = vld [vmem:[#allocation5 + $0x30] sm:$0xff] }
  0x24   :  { %94 = vmatprep.subr.mxu0 %v65_v9  ;;  %v47_v27 = vld [vmem:[#allocation5 + $0x28] sm:$0xff]  ;;  %v46_v28 = vld [vmem:[#allocation5 + $0x20] sm:$0xff]  ;;  %v45_v29 = vld [vmem:[#allocation5 + $0x18] sm:$0xff] }
  0x25   :  { %95 = vmatpush1.msra.mxu0 %v64_v10  ;;  %v44_v30 = vld [vmem:[#allocation5 + $0x10] sm:$0xff]  ;;  %v43_v31 = vld [vmem:[#allocation5 + $0x8] sm:$0xff]  ;;  %v42_v32 = vld [vmem:[#allocation5] sm:$0xff] }
  0x26   :  { %96 = vmatprep.subr.mxu0 %v63_v11  ;;  %v41_v33 = vld [vmem:[#allocation2] sm:$0x1]  ;;  %v74_v40 = vld [vmem:[%s310_s2] sm:$0x3] }
  0x27   :  { %97 = vmatpush1.msra.mxu0 %v62_v12  ;;  %v79_v41 = vrot.slane %v74_v40, %v78_v36  ;;  %v83_v42 = vrot.slane %v74_v40, %v82_v37 }
  0x28   :  { %98 = vmatprep.subr.mxu0 %v61_v13 }
  0x29   :  { %99 = vmatpush1.msra.mxu0 %v60_v14 }
  0x2a   :  { %100 = vmatprep.subr.mxu0 %v59_v15 }
  0x2b   :  { %101 = vmatpush1.msra.mxu0 %v58_v16 }
  0x2c   :  { %102 = vmatprep.subr.mxu0 %v57_v17 }
  0x2d   :  { %103 = vmatpush1.msra.mxu0 %v56_v18 }
  0x2e   :  { %104 = vmatprep.subr.mxu0 %v55_v19 }
  0x2f   :  { %105 = vmatpush1.msra.mxu0 %v54_v20 }
  0x30   :  { %106 = vmatprep.subr.mxu0 %v53_v21 }
  0x31   :  { %107 = vmatpush1.msra.mxu0 %v52_v22 }
  0x32   :  { %108 = vmatprep.subr.mxu0 %v51_v23 }
  0x33   :  { %109 = vmatpush1.msra.mxu0 %v50_v24 }
  0x34   :  { %110 = vmatprep.subr.mxu0 %v49_v25 }
  0x35   :  { %111 = vmatpush1.msra.mxu0 %v48_v26 }
  0x36   :  { %112 = vmatprep.subr.mxu0 %v47_v27 }
  0x37   :  { %113 = vmatpush1.msra.mxu0 %v46_v28 }
  0x38   :  { %114 = vmatprep.subr.mxu0 %v45_v29 }
  0x39   :  { %115 = vmatpush1.msra.mxu0 %v44_v30 }
  0x3a   :  { %116 = vmatprep.subr.mxu0 %v43_v31 }
  0x3b   :  { %117 = vmatpush1.msra.mxu0 %v42_v32 }
  0x3c   :  { %151 = vmatmul.mubr.f32.vlgmr.msra.gmra.mxu0 %v41_v33 }
  0xfc   :  { %v152_v44 = vpop.f32.mrf.mxu0 }
  0xfd   :  { %v153_v46 = vadd.f32 %v152_v44, %v79_v41 }
  0xfe   :  { %v154_v45 = vpop.f32.mrf.mxu0 }
  0xff   :  { %v155_v47 = vadd.f32 %v154_v45, %v83_v42 }
 0x101   :  { %v159_v49 = vcombine.low %v153_v46, %v155_v47 }
 0x103   :  { %v166_v50 = vrot.slane %v159_v49, %v165_v48 }
 0x105   :  { %v173_v51 = vrot.slane %v166_v50, %v165_v48 }
 0x107   :  { %179 = vst.msk [vmem:[#allocation7] sm:$0x3] %vm177_vm0, %v173_v51 }
 0x108   :  { %254 = shalt.err (!%p251_p0)
}
 0x109   :  { %189 = dma.vmem_to_hbm [thread:$0]  %s187_s26, 32, %s311_s3, [#allocation4]  }
 0x10a   :  { %267 = dma.done.wait [#allocation4], 32  }
 0x10b   :  { %268 = vsyncadd [#allocation4], 4294967264 }
 0x10c   :  { %193 = vsyncpa [#allocation3], 1 }
 0x10d   :  { %194 = vsyncpa [#allocation6], 1 }
 0x10e   :  { %195 = vsyncpa [#allocation4], 1 }

</bundles_post_ra>
